<compile_context>
chip_gen: v7x
topology: tpu7x:2x2x1
jax: 0.10.0
libtpu: 0.0.40
codegen_flags: <defaults>
</compile_context>

<pallas_src>
import jax
import jax.numpy as jnp
from jax.experimental import pallas as pl
from jax.experimental.pallas import tpu as pltpu


# TODO(synk): `utils.table_spwn` is not provided in the source tree; this is a
# deterministic even-contiguous-grouping table (each output step sums a
# contiguous block of input steps when T_in >= T_out, replicates when
# T_in < T_out).  Pass `trans_table=` to time_trans() to use the real table.
def table_spwn(in_T, out_T):
    if in_T >= out_T:
        base, rem = divmod(in_T, out_T)
        table, start = [], 0
        for i in range(out_T):
            size = base + (1 if i < rem else 0)
            table.append(list(range(start, start + size)))
            start += size
        return table
    return [[(i * in_T) // out_T] for i in range(out_T)]


def _make_time_trans_kernel(table, acc_dtype):
    """Kernel over one (T_in, tile_f) block -> (T_out, tile_f) block."""

    def kernel(x_ref, o_ref):
        x = x_ref[...].astype(acc_dtype)  # (T_in, tile_f), cast once per block
        rows = []
        for grp in table:  # static Python table -> static slices, pure VPU adds
            acc = x[grp[0]:grp[0] + 1, :]
            for j in grp[1:]:
                acc = acc + x[j:j + 1, :]
            rows.append(acc)
        o_ref[...] = jnp.concatenate(rows, axis=0).astype(o_ref.dtype)

    return kernel


def _pick_tile_f(F, in_T, out_T, itemsize, B,
                 budget_bytes=8 << 20, max_tile=32768):
    """Lane-tile size: big enough to amortize per-step overhead, small enough
    for v7x VMEM, and leaving >=2 parallel grid steps when B == 1."""
    if F <= 128:
        return F  # full (lane) dim as the block
    per_lane = (in_T + out_T) * itemsize * 2  # double-buffered in + out blocks
    cap = max(128, budget_bytes // max(per_lane, 1))
    tile = min(cap, max_tile, F)
    tile = max(128, (tile // 128) * 128)
    if B == 1 and F >= 256:
        # keep >= 2 grid steps on the parallel axes so both v7x TCs get work
        tile = min(tile, max(128, (F // 2 // 128) * 128))
    if tile >= F:
        if F % 128 == 0:
            return F
        tile = max(128, (F // 128) * 128)  # partial last block handles the rest
    return tile


def time_trans(x, out_T, *, trans_table=None, mode=0):
    """JAX/Pallas equivalent of TimeTrans.forward(x, out_T)."""
    B, in_T = x.shape[0], x.shape[1]
    feat_shape = x.shape[2:]
    if in_T == out_T:
        return x

    if trans_table is None:
        assert mode == 0, "mode != 0 requires an externally supplied trans_table"
        table = table_spwn(in_T, out_T)
    else:
        table = trans_table
    assert len(table) == out_T

    F = 1
    for d in feat_shape:
        F *= d

    x2 = x.reshape(B, in_T, F)  # free reshape, no HBM copy / transpose

    itemsize = jnp.dtype(x.dtype).itemsize
    tile_f = _pick_tile_f(F, in_T, out_T, itemsize, B)
    n_f = pl.cdiv(F, tile_f)

    acc_dtype = jnp.float32 if jnp.issubdtype(x.dtype, jnp.floating) else jnp.int32

    out2 = pl.pallas_call(
        _make_time_trans_kernel(table, acc_dtype),
        out_shape=jax.ShapeDtypeStruct((B, out_T, F), x.dtype),
        grid=(B, n_f),
        in_specs=[
            # batch dim squeezed; time-major block consumed in native layout
            pl.BlockSpec((None, in_T, tile_f), lambda b, f: (b, 0, f)),
        ],
        out_specs=pl.BlockSpec((None, out_T, tile_f), lambda b, f: (b, 0, f)),
        compiler_params=pltpu.CompilerParams(
            dimension_semantics=("parallel", "parallel"),
            vmem_limit_bytes=32 * 1024 * 1024,
        ),
    )(x2)

    return out2.reshape((B, out_T) + feat_shape)


def _ref_time_trans(x, out_T):
    """Pure-JAX reference of the PyTorch forward (gather + accumulate + stack)."""
    in_T = x.shape[1]
    if in_T == out_T:
        return x
    table = table_spwn(in_T, out_T)
    return jnp.stack([sum(x[:, j] for j in grp) for grp in table], axis=1)


if __name__ == "__main__":
    key = jax.random.PRNGKey(0)

    # Main case: B=2, T_in=8 -> T_out=4, feature (4, 16, 16), F = 1024.
    B, in_T, C, H, W = 2, 8, 4, 16, 16
    out_T = 4
    x = jax.random.normal(key, (B, in_T, C, H, W), dtype=jnp.float32)

    y = jax.block_until_ready(time_trans(x, out_T))
    ref = _ref_time_trans(x, out_T)
    assert y.shape == (B, out_T, C, H, W), y.shape
    assert y.dtype == x.dtype
    assert jnp.allclose(y, ref, atol=1e-5, rtol=1e-5)

    # Identity path (in_T == out_T).
    y_id = jax.block_until_ready(time_trans(x, in_T))
    assert jnp.array_equal(y_id, x)

    # Ragged groups + F not a multiple of 128 (F = 300, partial last tile).
    k1, k2 = jax.random.split(key)
    x2 = jax.random.normal(k1, (1, 6, 3, 10, 10), dtype=jnp.float32)
    y2 = jax.block_until_ready(time_trans(x2, 4))
    assert jnp.allclose(y2, _ref_time_trans(x2, 4), atol=1e-5, rtol=1e-5)

    # Upsampling path (T_in < T_out): pure replication/gather.
    x3 = jax.random.normal(k2, (2, 3, 4, 16, 16), dtype=jnp.float32)
    y3 = jax.block_until_ready(time_trans(x3, 6))
    assert jnp.allclose(y3, _ref_time_trans(x3, 6), atol=1e-5, rtol=1e-5)

    print("KERNEL_OK")
</pallas_src>

<mosaic_0001>
module attributes {stable_mosaic.version = 11 : i64} {
  func.func @kernel(%arg0: i32, %arg1: i32, %arg2: memref<1x8x1024xf32, #tpu.memory_space<vmem>>, %arg3: memref<1x4x1024xf32, #tpu.memory_space<vmem>>) attributes {dimension_semantics = [#tpu.dimension_semantics<parallel>, #tpu.dimension_semantics<parallel>], iteration_bounds = array<i64: 2, 1>, scalar_prefetch = 0 : i64, scratch_operands = 0 : i64, tpu.core_type = #tpu.core_type<tc>, window_params = [{transform_indices = @transform_0, window_bounds = array<i64: 1, 8, 1024>}, {transform_indices = @transform_1, window_bounds = array<i64: 1, 4, 1024>}]} {
    %c0 = arith.constant 0 : index
    %c0_0 = arith.constant 0 : index
    %c0_1 = arith.constant 0 : index
    %0 = vector.load %arg2[%c0, %c0_0, %c0_1] : memref<1x8x1024xf32, #tpu.memory_space<vmem>>, vector<1x8x1024xf32>
    %1 = vector.shape_cast %0 : vector<1x8x1024xf32> to vector<8x1024xf32>
    %2 = vector.extract_strided_slice %1 {offsets = [0, 0], sizes = [1, 1024], strides = [1, 1]} : vector<8x1024xf32> to vector<1x1024xf32>
    %3 = vector.extract_strided_slice %1 {offsets = [1, 0], sizes = [1, 1024], strides = [1, 1]} : vector<8x1024xf32> to vector<1x1024xf32>
    %4 = arith.addf %2, %3 : vector<1x1024xf32>
    %5 = vector.extract_strided_slice %1 {offsets = [2, 0], sizes = [1, 1024], strides = [1, 1]} : vector<8x1024xf32> to vector<1x1024xf32>
    %6 = vector.extract_strided_slice %1 {offsets = [3, 0], sizes = [1, 1024], strides = [1, 1]} : vector<8x1024xf32> to vector<1x1024xf32>
    %7 = arith.addf %5, %6 : vector<1x1024xf32>
    %8 = vector.extract_strided_slice %1 {offsets = [4, 0], sizes = [1, 1024], strides = [1, 1]} : vector<8x1024xf32> to vector<1x1024xf32>
    %9 = vector.extract_strided_slice %1 {offsets = [5, 0], sizes = [1, 1024], strides = [1, 1]} : vector<8x1024xf32> to vector<1x1024xf32>
    %10 = arith.addf %8, %9 : vector<1x1024xf32>
    %11 = vector.extract_strided_slice %1 {offsets = [6, 0], sizes = [1, 1024], strides = [1, 1]} : vector<8x1024xf32> to vector<1x1024xf32>
    %12 = vector.extract_strided_slice %1 {offsets = [7, 0], sizes = [1, 1024], strides = [1, 1]} : vector<8x1024xf32> to vector<1x1024xf32>
    %13 = arith.addf %11, %12 : vector<1x1024xf32>
    %14 = tpu.concatenate %4, %7, %10, %13 in 0 : vector<1x1024xf32>, vector<1x1024xf32>, vector<1x1024xf32>, vector<1x1024xf32> -> vector<4x1024xf32>
    %c0_2 = arith.constant 0 : index
    %c0_3 = arith.constant 0 : index
    %c0_4 = arith.constant 0 : index
    %15 = vector.load %arg3[%c0_2, %c0_3, %c0_4] : memref<1x4x1024xf32, #tpu.memory_space<vmem>>, vector<1x4x1024xf32>
    %16 = vector.shape_cast %15 : vector<1x4x1024xf32> to vector<4x1024xf32>
    %17 = vector.shape_cast %14 : vector<4x1024xf32> to vector<1x4x1024xf32>
    tpu.vector_store %arg3[%c0_2, %c0_3, %c0_4], %17 {strides = array<i32>} : memref<1x4x1024xf32, #tpu.memory_space<vmem>>, vector<1x4x1024xf32>,
    return
  }
  func.func @transform_0(%arg0: i32, %arg1: i32) -> (i32, i32, i32) {
    %c0_i32 = arith.constant 0 : i32
    %c0_i32_0 = arith.constant 0 : i32
    return %arg0, %c0_i32, %arg1 : i32, i32, i32
  }
  func.func @transform_1(%arg0: i32, %arg1: i32) -> (i32, i32, i32) {
    %c0_i32 = arith.constant 0 : i32
    %c0_i32_0 = arith.constant 0 : i32
    return %arg0, %c0_i32, %arg1 : i32, i32, i32
  }
}

</mosaic_0001>

<bundles_post_ra>
// kernel: tpu_custom_call.1
= control target key start
LH: loop header
LB: loop body
LE: loop exit
PB: predicated region body
PF: predicated region fallthrough
CT: control target
= control target key end

     0   :  { %6 = vsyncpa [#allocation3], 0  ;;  %s806_s0 = inlined_call_operand.hbm [shape: f32[2,8,1024], index: 0, kind: input, shape index: {}]   ;;  %s807_s1 = inlined_call_operand.hbm [shape: f32[2,4,1024], index: 1, kind: output, shape index: {}]  }
   0x1   :  { %8 = vsyncpa [#allocation3 + $0x1], 0 }
   0x2   :  { %9 = vsyncpa [#allocation4], 0 }
   0x3   :  { %11 = vsyncpa [#allocation4 + $0x1], 0  ;;  %s602_s6 = smov 0   ;;  %s604_s7 = smov 0  }
   0x4   :  { %s606_s8 = smov 0   ;;  %s608_s9 = smov 0  }
   0x5   :  { %s610_s10 = smov 0   ;;  %s612_s11 = smov 0  }
   0x6 LB: > { %s397_s12 = sadd.s32 4294967295, %s588_s11   ;;  %s398_s13 = sadd.s32 4294967294, %s588_s11   ;;  %s588_s11 = sphi %s612_s11, %s17_s11   ;;  %s584_s10 = sphi %s610_s10, %s823_s10   ;;  %s580_s9 = sphi %s608_s9, %s822_s9   ;;  %s576_s8 = sphi %s606_s8, %s821_s8   ;;  %s572_s7 = sphi %s604_s7, %s820_s7   ;;  %s568_s6 = sphi %s602_s6, %s819_s6  }
   0x7   : > { %s29_s14 = sadd.s32 1, %s584_s10  ;;  %s38_s15 = sadd.s32 1, %s576_s8 }
   0x8   : > { %p31_p0 = scmp.ge.s32.totalorder %s29_s14, 2  ;;  %p45_p1 = scmp.ne.s32.totalorder %s576_s8, %s572_s7 }
   0x9   : > { %p46_p2 = scmp.eq.s32.totalorder %s588_s11, 0  ;;  %p51_p3 = scmp.ne.s32.totalorder %s572_s7, %s568_s6 }
   0xa   : > { %s825_s14 = smov (%p31_p0, %s29_s14), 0  ;;  %p52_p5 = scmp.eq.s32.totalorder %s397_s12, 0 }
   0xb   : > { %p643_p4 = por %p46_p2, %p45_p1  ;;  %s33_s17 = ssub.s32 %s584_s10, %s825_s14 }
   0xc   : > { %p77_p6 = scmp.eq.s32.totalorder %s397_s12, 1  ;;  %p36_p7 = scmp.eq.s32.totalorder %s33_s17, 0 }
   0xd   : > { %p649_p8 = por %p52_p5, %p51_p3  ;;  %p83_p10 = scmp.eq.s32.totalorder %s398_s13, 1 }
   0xe   : > { %p653_p9 = por %p77_p6, %p45_p1  ;;  %p426_p13 = scmp.lt.s32.totalorder %s588_s11, 2 }
   0xf   : > { %s658_s20 = scalar_select %p36_p7, %s576_s8, %s38_s15  }
  0x10   : > { %s811_s19 = scalar_select %p653_p9, 1, 0 }
  0x11   : > { %p660_p11 = por %p83_p10, %p51_p3  ;;  %s103_s22 = sand.u32 1, %s576_s8  }
  0x12   : > { %s401_s23 = sshll.u32 %s103_s22, 6  ;;  %s412_s24 = sshll.u32 %s584_s10, 10 }
  0x13   : > { %s812_s21 = scalar_select %p660_p11, 1, 0 }
  0x14   : > { %s671_s27 = scalar_lea.hbm %s806_s0, %s412_s24  ;;  %s107_s28 = scalar_lea.vmem [#allocation2], %s401_s23 }
  0x15   : > { %s117_s29 = sshll.u32 %s107_s28, 4  ;;  %p677_p0 = pnand %p426_p13, %p643_p4  ;;  %s673_s29 = int_to_ptr.vmem [resolvable:$true] %s117_s29 }
  0x16   : > { %s104_s2 = scalar_lea.sflag [#allocation3], %s103_s22  ;;  %s476_s3 = scalar_lea.hbm %s671_s27, 1024 }
  0x17   : > { %p477_p3 = scmp.ne.s32.totalorder %s671_s27, %s476_s3  ;;  %p478_p5 = pneg %p677_p0 }
  0x18   : > { %s481_s12 = scalar_lea.hbm %s806_s0, 2048  ;;  %p482_p4 = scmp.lt.u32.totalorder %s671_s27, %s806_s0 }
  0x19   : > { %p479_p6 = pnand %p478_p5, %p477_p3  ;;  %p483_p10 = scmp.lt.u32.totalorder %s481_s12, %s476_s3 }
  0x1a   : > { %p485_p12 = scmp.lt.u32.totalorder %s476_s3, %s671_s27 }
  0x1b   : > { %p480_p7 = pneg %p479_p6  ;;  %p484_p13 = por %p483_p10, %p482_p4 }
  0x1d   : > { %p486_p1 = por %p485_p12, %p484_p13 }
  0x1f   : > { %p487_p2 = pnand %p486_p1, %p480_p7 }
  0x21   : > { %490 = shalt.err (!%p487_p2)
}
  0x22   : > { %s491_s16 = scalar_lea.vmem %s673_s29, 1024  ;;  %s590_s17 = smov [#allocation2]  }
  0x23   : > { %p492_p3 = scmp.ne.s32.totalorder %s673_s29, %s491_s16  ;;  %s496_s22 = sshll.u32 %s590_s17, 4  ;;  %s497_s22 = int_to_ptr.vmem [resolvable:$false] %s496_s22 }
  0x24   : > { %s498_s23 = scalar_lea.vmem %s497_s22, 2048  ;;  %p499_p9 = scmp.lt.s32.totalorder %s673_s29, %s497_s22 }
  0x25   : > { %p494_p6 = pnand %p492_p3, %p478_p5  ;;  %p500_p4 = scmp.lt.s32.totalorder %s498_s23, %s491_s16 }
  0x27   : > { %p495_p11 = pneg %p494_p6  ;;  %p501_p10 = por %p500_p4, %p499_p9 }
  0x29   : > { %p502_p12 = pnand %p501_p10, %p495_p11 }
  0x2b   : > { %505 = shalt.err (!%p502_p12)
}
  0x2c   : > { %421 = dma.hbm_to_vmem [thread:$0]  (!%p677_p0), %s671_s27, 1024, %s673_s29, %s104_s2  }
  0x2d   : > { %p814_p1 = scmp.lt.s32.totalorder %s588_s11, 3  ;;  %p815_p2 = scmp.ge.s32.totalorder %s588_s11, 1 }
  0x2f   : > { %p123_p5 = pnand %p815_p2, %p814_p1 }
  0x30   : > { %s713_s24 = sand.u32 (!%p123_p5), 1, %s572_s7  }
  0x31   : > { %126 = sbr.rel (%p123_p5) target bundleno = 94 (0x5e), region = 24  ;;  %s405_s25 = sshll.u32 (!%p123_p5), %s713_s24, 6 }
  0x32   : > { %s129_s26 = scalar_lea.sflag (!%p123_p5), [#allocation3], %s713_s24  ;;  %s132_s28 = scalar_lea.vmem (!%p123_p5), [#allocation2], %s405_s25 }
  0x38   : > { %559 = dma.done.wait (%p649_p8), %s129_s26, 1024  }
  0x39   : > { %561 = vsyncadd (%p649_p8), %s129_s26, 4294966272  ;;  %v153_v0 = vld [vmem:[%s132_s28] sm:$0xff]  ;;  %v154_v1 = vld [vmem:[%s132_s28 + $0x8] sm:$0xff]  ;;  %vm249_vm0 = vcmask 1040384   ;;  %vm258_vm1 = vcmask 1041408   ;;  %vm267_vm2 = vcmask 1042432  }
  0x3a   : > { %v155_v2 = vld [vmem:[%s132_s28 + $0x10] sm:$0xff]  ;;  %v169_v3 = vrot.slane %v153_v0, 1  ;;  %v170_v4 = vrot.slane %v154_v1, 1  ;;  %v156_v5 = vld [vmem:[%s132_s28 + $0x18] sm:$0xff]  ;;  %v157_v7 = vld [vmem:[%s132_s28 + $0x20] sm:$0xff]  ;;  %s406_s18 = sshll.u32 %s713_s24, 5 }
  0x3b   : > { %v171_v6 = vrot.slane %v155_v2, 1  ;;  %v158_v8 = vld [vmem:[%s132_s28 + $0x28] sm:$0xff]  ;;  %v172_v9 = vrot.slane %v156_v5, 1  ;;  %v173_v10 = vrot.slane %v157_v7, 1  ;;  %v159_v12 = vld [vmem:[%s132_s28 + $0x30] sm:$0xff]  ;;  %v160_v13 = vld [vmem:[%s132_s28 + $0x38] sm:$0xff] }
  0x3c   : > { %v174_v11 = vrot.slane %v158_v8, 1  ;;  %v185_v14 = vadd.f32 %v169_v3, %v153_v0  ;;  %v186_v15 = vadd.f32 %v170_v4, %v154_v1  ;;  %v175_v17 = vrot.slane %v159_v12, 1  ;;  %s734_s27 = scalar_lea.vmem [#allocation5], %s406_s18  ;;  %s413_s30 = sshll.u32 %s580_s9, 9 }
  0x3d   : > { %v187_v16 = vadd.f32 %v171_v6, %v155_v2  ;;  %v188_v18 = vadd.f32 %v172_v9, %v156_v5  ;;  %v189_v19 = vadd.f32 %v173_v10, %v157_v7  ;;  %v176_v21 = vrot.slane %v160_v13, 1  ;;  %s313_s29 = sshll.u32 %s734_s27, 4  ;;  %s758_s4 = scalar_lea.hbm %s807_s1, %s413_s30  ;;  %s753_s29 = int_to_ptr.vmem [resolvable:$true] %s313_s29 }
  0x3e   : > { %v190_v20 = vadd.f32 %v174_v11, %v158_v8  ;;  %v201_v22 = vrot.slane %v185_v14, 1  ;;  %v202_v23 = vrot.slane %v186_v15, 1  ;;  %v217_v24 = vrot.slane %v185_v14, 2  ;;  %s297_s9 = scalar_lea.sflag [#allocation4], %s713_s24  ;;  %s506_s5 = scalar_lea.vmem %s753_s29, 512 }
  0x3f   : > { %v218_v25 = vrot.slane %v186_v15, 2  ;;  %v233_v26 = vrot.slane %v185_v14, 3  ;;  %v234_v27 = vrot.slane %v186_v15, 3  ;;  %v203_v28 = vrot.slane %v187_v16, 1  ;;  %p507_p8 = scmp.ne.s32.totalorder %s753_s29, %s506_s5  ;;  %p816_p9 = scmp.ne.s32.totalorder %s811_s19, 0 }
  0x40   : > { %v204_v29 = vrot.slane %v188_v18, 1  ;;  %v250_v30 = vsel %vm249_vm0, %v185_v14, %v201_v22  ;;  %v251_v31 = vsel %vm249_vm0, %v186_v15, %v202_v23  ;;  %v219_v32 = vrot.slane %v187_v16, 2  ;;  %s591_s12 = smov [#allocation5]  }
  0x41   : > { %v220_v33 = vrot.slane %v188_v18, 2  ;;  %v259_v34 = vsel %vm258_vm1, %v250_v30, %v217_v24  ;;  %v260_v35 = vsel %vm258_vm1, %v251_v31, %v218_v25  ;;  %v235_v36 = vrot.slane %v187_v16, 3  ;;  %p508_p11 = pnand %p507_p8, %p816_p9  ;;  %s510_s13 = sshll.u32 %s591_s12, 4  ;;  %s511_s13 = int_to_ptr.vmem [resolvable:$false] %s510_s13 }
  0x42   : > { %v236_v37 = vrot.slane %v188_v18, 3  ;;  %v268_v38 = vsel %vm267_vm2, %v259_v34, %v233_v26  ;;  %v269_v39 = vsel %vm267_vm2, %v260_v35, %v234_v27  ;;  %v252_v40 = vsel %vm249_vm0, %v187_v16, %v203_v28  ;;  %s512_s15 = scalar_lea.vmem %s511_s13, 1024  ;;  %p513_p7 = scmp.lt.s32.totalorder %s753_s29, %s511_s13 }
  0x43   : > { %v253_v41 = vsel %vm249_vm0, %v188_v18, %v204_v29  ;;  %v284_v42 = vcombine.low %v268_v38, %v269_v39  ;;  %v261_v43 = vsel %vm258_vm1, %v252_v40, %v219_v32  ;;  %v205_v45 = vrot.slane %v189_v19, 1  ;;  %p509_p0 = pneg %p508_p11  ;;  %p514_p13 = scmp.lt.s32.totalorder %s512_s15, %s506_s5 }
  0x44   : > { %v262_v44 = vsel %vm258_vm1, %v253_v41, %v220_v33  ;;  %v270_v46 = vsel %vm267_vm2, %v261_v43, %v235_v36  ;;  %v206_v48 = vrot.slane %v190_v20, 1  ;;  %v221_v49 = vrot.slane %v189_v19, 2 }
  0x45   : > { %v271_v47 = vsel %vm267_vm2, %v262_v44, %v236_v37  ;;  %292 = vst [vmem:[%s734_s27] sm:$0xff] %v284_v42  ;;  %v222_v51 = vrot.slane %v190_v20, 2  ;;  %v237_v52 = vrot.slane %v189_v19, 3  ;;  %v238_v53 = vrot.slane %v190_v20, 3  ;;  %p515_p3 = por %p514_p13, %p513_p7 }
  0x46   : > { %v285_v50 = vcombine.low %v270_v46, %v271_v47  ;;  %v254_v54 = vsel %vm249_vm0, %v189_v19, %v205_v45  ;;  %v255_v55 = vsel %vm249_vm0, %v190_v20, %v206_v48  ;;  %v191_v56 = vadd.f32 %v175_v17, %v159_v12 }
  0x47   : > { %v192_v57 = vadd.f32 %v176_v21, %v160_v13  ;;  %v263_v58 = vsel %vm258_vm1, %v254_v54, %v221_v49  ;;  %v264_v59 = vsel %vm258_vm1, %v255_v55, %v222_v51  ;;  %p516_p6 = pnand %p515_p3, %p509_p0 }
  0x48   : > { %293 = vst [vmem:[%s734_s27 + $0x8] sm:$0xff] %v285_v50  ;;  %v272_v60 = vsel %vm267_vm2, %v263_v58, %v237_v52  ;;  %v273_v61 = vsel %vm267_vm2, %v264_v59, %v238_v53  ;;  %v207_v62 = vrot.slane %v191_v56, 1  ;;  %v223_v1 = vrot.slane %v191_v56, 2 }
  0x49   : > { %v208_v63 = vrot.slane %v192_v57, 1  ;;  %v286_v0 = vcombine.low %v272_v60, %v273_v61  ;;  %v224_v2 = vrot.slane %v192_v57, 2  ;;  %v239_v3 = vrot.slane %v191_v56, 3 }
  0x4a   : > { %v240_v4 = vrot.slane %v192_v57, 3  ;;  %v256_v5 = vsel %vm249_vm0, %v191_v56, %v207_v62 }
  0x4b   : > { %v257_v6 = vsel %vm249_vm0, %v192_v57, %v208_v63  ;;  %294 = vst [vmem:[%s734_s27 + $0x10] sm:$0xff] %v286_v0  ;;  %v265_v7 = vsel %vm258_vm1, %v256_v5, %v223_v1 }
  0x4c   : > { %v266_v8 = vsel %vm258_vm1, %v257_v6, %v224_v2  ;;  %v274_v9 = vsel %vm267_vm2, %v265_v7, %v239_v3 }
  0x4d   : > { %v275_v10 = vsel %vm267_vm2, %v266_v8, %v240_v4 }
  0x4e   : > { %v287_v11 = vcombine.low %v274_v9, %v275_v10 }
  0x50   : > { %295 = vst [vmem:[%s734_s27 + $0x18] sm:$0xff] %v287_v11 }
  0x51   : > { %519 = shalt.err (!%p516_p6)
}
  0x52   : > { %s520_s16 = scalar_lea.hbm %s758_s4, 512  ;;  %s524_s23 = scalar_lea.hbm %s807_s1, 1024 }
  0x53   : > { %p521_p4 = scmp.ne.s32.totalorder %s758_s4, %s520_s16  ;;  %p525_p1 = scmp.lt.u32.totalorder %s758_s4, %s807_s1 }
  0x54   : > { %p526_p2 = scmp.lt.u32.totalorder %s524_s23, %s520_s16  ;;  %p528_p8 = scmp.lt.u32.totalorder %s520_s16, %s758_s4 }
  0x55   : > { %p522_p10 = pnand %p521_p4, %p816_p9 }
  0x56   : > { %p527_p5 = por %p526_p2, %p525_p1 }
  0x57   : > { %p523_p12 = pneg %p522_p10 }
  0x58   : > { %p529_p11 = por %p528_p8, %p527_p5 }
  0x5a   : > { %p530_p0 = pnand %p529_p11, %p523_p12 }
  0x5c   : > { %533 = shalt.err (!%p530_p0)
}
  0x5d   : > { %416 = dma.vmem_to_hbm [thread:$0]  (%p816_p9), %s753_s29, 512, %s758_s4, %s297_s9  }
  0x5e PF: > { %s325_s26 = sand.u32 1, %s568_s6   ;;  %p817_p7 = scmp.ne.s32.totalorder %s812_s21, 0 }
  0x5f   : > { %p818_p13 = scmp.ge.s32.totalorder %s588_s11, 2  ;;  %s326_s28 = scalar_lea.sflag [#allocation4], %s325_s26 }
  0x61   : > { %p423_p3 = pnand %p818_p13, %p817_p7 }
  0x63   : > { %563 = dma.done.wait (!%p423_p3), %s326_s28, 512  }
  0x64   : > { %565 = vsyncadd (!%p423_p3), %s326_s28, 4294966784  ;;  %s17_s11 = sadd.s32 1, %s588_s11   ;;  %s819_s6 = smov %s572_s7 }
  0x65   : > { %p14_p6 = scmp.ge.s32.totalorder %s17_s11, 4   ;;  %s820_s7 = smov %s576_s8 }
  0x66   : > { %s821_s8 = smov %s658_s20  ;;  %s822_s9 = smov %s584_s10 }
  0x67   : > { %s823_s10 = smov %s825_s14  ;;  %16 = sbr.rel (!%p14_p6) target bundleno = 6 (0x6), region = 69 }
  0x6e   :  { %331 = vsyncpa [#allocation3], 1 }
  0x6f   :  { %333 = vsyncpa [#allocation3 + $0x1], 1 }
  0x70   :  { %334 = vsyncpa [#allocation4], 1 }
  0x71   :  { %336 = vsyncpa [#allocation4 + $0x1], 1 }

</bundles_post_ra>
